<compile_context>
chip_gen: v6e
topology: v6e:2x2x1
jax: 0.10.0
libtpu: 0.0.40
codegen_flags: <defaults>
</compile_context>

<pallas_src>
import functools

import jax
import jax.numpy as jnp
from jax import lax
from jax.experimental import pallas as pl
from jax.experimental.pallas import tpu as pltpu

_LANES = 128


# ----------------------------------------------------------------------------
# small helpers
# ----------------------------------------------------------------------------
def _round_up(x, m):
    return ((x + m - 1) // m) * m


def _largest_divisor(n, cap):
    cap = max(1, min(cap, n))
    for t in range(cap, 0, -1):
        if n % t == 0:
            return t
    return 1


def _pick_seq_tile(n, cap, mult=8):
    """Sublane-axis tile: divisor of n that is a multiple of `mult` (or n)."""
    if n <= cap:
        return n
    for m in (mult, 8):
        t = (cap // m) * m
        while t >= m:
            if n % t == 0:
                return t
            t -= m
    return n


def _pick_lane_tile(n, cap):
    """Lane-axis tile: multiple of 128 dividing n, or n itself."""
    if n <= cap:
        return n
    t = (cap // _LANES) * _LANES
    while t >= _LANES:
        if n % t == 0:
            return t
        t -= _LANES
    return n


def _sublane_mult(dtype):
    itemsize = jnp.dtype(dtype).itemsize
    return 8 if itemsize >= 4 else (16 if itemsize == 2 else 32)


def _lanes_to(x, n):
    """x: (..., 128) with identical values across lanes -> (..., n) (or (...,1))."""
    if n == x.shape[-1]:
        return x
    if n < _LANES:
        return x[..., :n]
    if n % _LANES == 0:
        reps = (1,) * (x.ndim - 1) + (n // _LANES,)
        return jnp.tile(x, reps)
    return x[..., :1]  # broadcast against the target via VALU


_VMEM_BUDGET_CACHE = [None]


def _vmem_budget_bytes():
    if _VMEM_BUDGET_CACHE[0] is None:
        cap = 64 * 1024 * 1024  # conservative fallback (v7x-sized)
        try:
            info = pltpu.get_tpu_info()
            cap = int(getattr(info, "vmem_capacity_bytes", cap))
        except Exception:  # pragma: no cover - info query unavailable
            pass
        _VMEM_BUDGET_CACHE[0] = (cap * 3) // 4  # leave headroom for the compiler
    return _VMEM_BUDGET_CACHE[0]


def _compiler_params(dim_sem, need_bytes):
    limit = min(max(2 * int(need_bytes), 16 * 1024 * 1024), _vmem_budget_bytes())
    return pltpu.CompilerParams(dimension_semantics=dim_sem,
                                vmem_limit_bytes=int(limit))


# ----------------------------------------------------------------------------
# Linear projection kernel (tiled over M, N and K with f32 accumulator)
# ----------------------------------------------------------------------------
def _linear_kernel(x_ref, w_ref, b_ref, o_ref, acc_ref, *, mm_dtype):
    kk = pl.program_id(2)

    @pl.when(kk == 0)
    def _():
        acc_ref[...] = jnp.zeros_like(acc_ref)

    x = x_ref[...]
    w = w_ref[...]
    if mm_dtype is not None:
        x = x.astype(mm_dtype)
        w = w.astype(mm_dtype)
    # y = x @ W^T  (W is (out_dim, in_dim) like torch.nn.Linear).
    acc_ref[...] += lax.dot_general(x, w, (((1,), (1,)), ((), ())),
                                    preferred_element_type=jnp.float32)

    @pl.when(kk == pl.num_programs(2) - 1)
    def _():
        o_ref[...] = (acc_ref[...] + b_ref[...].astype(jnp.float32)
                      ).astype(o_ref.dtype)


def pallas_linear(x2d, w, b, *, block_m=256, block_n=512, block_k=512,
                  mm_dtype=None):
    """x2d: [N, in_dim], w: [out_dim, in_dim], b: [out_dim] -> [N, out_dim]."""
    n, in_dim = x2d.shape
    out_dim = w.shape[0]
    tm = min(block_m, _round_up(n, 8))
    n_pad = _round_up(n, tm)
    if n_pad != n:
        x2d = jnp.pad(x2d, ((0, n_pad - n), (0, 0)))
    tn = _pick_lane_tile(out_dim, block_n)
    tk = _pick_lane_tile(in_dim, block_k)
    itm = jnp.dtype(x2d.dtype).itemsize
    need = (2 * (tm * tk + tn * tk + tn + tm * tn) * itm + tm * tn * 4)
    out = pl.pallas_call(
        functools.partial(_linear_kernel, mm_dtype=mm_dtype),
        out_shape=jax.ShapeDtypeStruct((n_pad, out_dim), x2d.dtype),
        grid=(n_pad // tm, out_dim // tn, in_dim // tk),
        in_specs=[
            pl.BlockSpec((tm, tk), lambda i, j, k: (i, k)),
            pl.BlockSpec((tn, tk), lambda i, j, k: (j, k)),
            pl.BlockSpec((1, tn), lambda i, j, k: (0, j)),
        ],
        out_specs=pl.BlockSpec((tm, tn), lambda i, j, k: (i, j)),
        scratch_shapes=[pltpu.VMEM((tm, tn), jnp.float32)],
        compiler_params=_compiler_params(("parallel", "parallel", "arbitrary"),
                                         need),
    )(x2d, w, b.reshape(1, out_dim))
    return out[:n] if n_pad != n else out


# ----------------------------------------------------------------------------
# Fused-layout flash attention (head_dim % 128 == 0): reads heads straight
# from the 2-D projection output, writes head-merged [B*T, E] output.
# ----------------------------------------------------------------------------
def _flash2d_kernel(q_ref, k_ref, v_ref, o_ref, m_sc, l_sc, acc_sc, *,
                    gh, d, mm_dtype):
    kv = pl.program_id(3)

    @pl.when(kv == 0)
    def _():
        m_sc[...] = jnp.full_like(m_sc, -jnp.inf)
        l_sc[...] = jnp.zeros_like(l_sc)
        acc_sc[...] = jnp.zeros_like(acc_sc)

    q = q_ref[...]                       # (bt, gh*d)  already scaled
    k = k_ref[...]                       # (bk, gh*d)
    v = v_ref[...]
    if mm_dtype is not None:
        q = q.astype(mm_dtype)
        k = k.astype(mm_dtype)
        v = v.astype(mm_dtype)

    for hh in range(gh):                 # static unroll over heads in group
        cd = slice(hh * d, (hh + 1) * d)
        cl = slice(hh * _LANES, (hh + 1) * _LANES)
        qh, kh, vh = q[:, cd], k[:, cd], v[:, cd]
        s = lax.dot_general(qh, kh, (((1,), (1,)), ((), ())),
                            preferred_element_type=jnp.float32)   # (bt, bk)
        m_prev = m_sc[:, cl]                                       # (bt, 128)
        m_new = jnp.maximum(m_prev, jnp.max(s, axis=-1, keepdims=True))
        alpha = jnp.exp(m_prev - m_new)
        p = jnp.exp(s - _lanes_to(m_new, s.shape[-1]))
        l_sc[:, cl] = alpha * l_sc[:, cl] + jnp.sum(p, axis=-1, keepdims=True)
        acc_sc[:, cd] = _lanes_to(alpha, d) * acc_sc[:, cd] + lax.dot_general(
            p.astype(vh.dtype), vh, (((1,), (0,)), ((), ())),
            preferred_element_type=jnp.float32)
        m_sc[:, cl] = m_new

    @pl.when(kv == pl.num_programs(3) - 1)
    def _():
        inv_l = pl.reciprocal(l_sc[...], approx=True)              # (bt, gh*128)
        for hh in range(gh):
            cd = slice(hh * d, (hh + 1) * d)
            cl = slice(hh * _LANES, (hh + 1) * _LANES)
            o_ref[:, cd] = (acc_sc[:, cd] * _lanes_to(inv_l[:, cl], d)
                            ).astype(o_ref.dtype)


def pallas_flash_attention_fused(q2d, k2d, v2d, *, B, H, T, S, D,
                                 q_col=0, k_col=0, v_col=0, out_dtype=None,
                                 block_t=512, block_k=512, block_h=4,
                                 mm_dtype=None):
    """q2d: [B*T, >=q_col+H*D], k2d/v2d: [B*S, ...] -> [B*T, H*D] head-merged."""
    assert D % _LANES == 0 and T % 8 == 0 and S % 8 == 0
    out_dtype = out_dtype or q2d.dtype
    mult = _sublane_mult(q2d.dtype)
    bt = _pick_seq_tile(T, block_t, mult)
    bk = _pick_seq_tile(S, block_k, mult)
    gh = _largest_divisor(H, block_h)
    if B * (T // bt) * (H // gh) < 2 and H > 1:   # keep both v7x cores busy
        gh = _largest_divisor(H, max(H // 2, 1))
    gd = gh * D
    assert q_col % gd == 0 and k_col % gd == 0 and v_col % gd == 0
    qo, ko, vo = q_col // gd, k_col // gd, v_col // gd
    qt, st = T // bt, S // bk

    itm = jnp.dtype(q2d.dtype).itemsize
    need = (2 * (2 * bt * gd + 2 * bk * gd) * itm
            + 2 * bt * gh * _LANES * 4 + bt * gd * 4 + 2 * bt * bk * 4)

    return pl.pallas_call(
        functools.partial(_flash2d_kernel, gh=gh, d=D, mm_dtype=mm_dtype),
        out_shape=jax.ShapeDtypeStruct((B * T, H * D), out_dtype),
        grid=(B, H // gh, qt, st),
        in_specs=[
            pl.BlockSpec((bt, gd), lambda b, hg, qi, kj: (b * qt + qi, qo + hg)),
            pl.BlockSpec((bk, gd), lambda b, hg, qi, kj: (b * st + kj, ko + hg)),
            pl.BlockSpec((bk, gd), lambda b, hg, qi, kj: (b * st + kj, vo + hg)),
        ],
        out_specs=pl.BlockSpec((bt, gd),
                               lambda b, hg, qi, kj: (b * qt + qi, hg)),
        scratch_shapes=[
            pltpu.VMEM((bt, gh * _LANES), jnp.float32),   # running max
            pltpu.VMEM((bt, gh * _LANES), jnp.float32),   # running denom
            pltpu.VMEM((bt, gd), jnp.float32),            # accumulator
        ],
        compiler_params=_compiler_params(
            ("parallel", "parallel", "parallel", "arbitrary"), need),
    )(q2d, k2d, v2d)


# ----------------------------------------------------------------------------
# Generic [B*H, T, D] flash attention (fallback for small head_dim)
# ----------------------------------------------------------------------------
def _flash3d_kernel(q_ref, k_ref, v_ref, o_ref, m_sc, l_sc, acc_sc, *,
                    mm_dtype):
    kv = pl.program_id(2)

    @pl.when(kv == 0)
    def _():
        m_sc[...] = jnp.full_like(m_sc, -jnp.inf)
        l_sc[...] = jnp.zeros_like(l_sc)
        acc_sc[...] = jnp.zeros_like(acc_sc)

    q = q_ref[...]                                    # (g, bt, d) already scaled
    k = k_ref[...]                                    # (g, bk, d)
    v = v_ref[...]
    if mm_dtype is not None:
        q = q.astype(mm_dtype)
        k = k.astype(mm_dtype)
        v = v.astype(mm_dtype)

    s = jnp.einsum("gqd,gkd->gqk", q, k,
                   preferred_element_type=jnp.float32)             # (g, bt, bk)

    m_prev = m_sc[...]                                              # (g, bt, 128)
    m_new = jnp.maximum(m_prev, jnp.max(s, axis=-1, keepdims=True))
    alpha = jnp.exp(m_prev - m_new)
    p = jnp.exp(s - _lanes_to(m_new, s.shape[-1]))
    l_sc[...] = alpha * l_sc[...] + jnp.sum(p, axis=-1, keepdims=True)
    acc_sc[...] = _lanes_to(alpha, acc_sc.shape[-1]) * acc_sc[...] + jnp.einsum(
        "gqk,gkd->gqd", p.astype(v.dtype), v,
        preferred_element_type=jnp.float32)
    m_sc[...] = m_new

    @pl.when(kv == pl.num_programs(2) - 1)
    def _():
        inv_l = pl.reciprocal(l_sc[...], approx=True)
        o_ref[...] = (acc_sc[...] * _lanes_to(inv_l, acc_sc.shape[-1])
                      ).astype(o_ref.dtype)


def pallas_flash_attention(q, k, v, *, block_g=8, block_t=512, block_k=512,
                           mm_dtype=None):
    """q: [BH, T, D], k/v: [BH, S, D] -> out [BH, T, D] (no weights)."""
    bh, t, d = q.shape
    s_len = k.shape[1]
    mult = _sublane_mult(q.dtype)
    g = _largest_divisor(bh, min(block_g, max(bh // 2, 1)))
    bt = _pick_seq_tile(t, block_t, mult)
    bk = _pick_seq_tile(s_len, block_k, mult)
    itm = jnp.dtype(q.dtype).itemsize
    need = (2 * (2 * g * bt * d + 2 * g * bk * d) * itm
            + 2 * g * bt * _LANES * 4 + g * bt * d * 4 + 2 * g * bt * bk * 4)
    return pl.pallas_call(
        functools.partial(_flash3d_kernel, mm_dtype=mm_dtype),
        out_shape=jax.ShapeDtypeStruct((bh, t, d), q.dtype),
        grid=(bh // g, t // bt, s_len // bk),
        in_specs=[
            pl.BlockSpec((g, bt, d), lambda i, j, kk: (i, j, 0)),
            pl.BlockSpec((g, bk, d), lambda i, j, kk: (i, kk, 0)),
            pl.BlockSpec((g, bk, d), lambda i, j, kk: (i, kk, 0)),
        ],
        out_specs=pl.BlockSpec((g, bt, d), lambda i, j, kk: (i, j, 0)),
        scratch_shapes=[
            pltpu.VMEM((g, bt, _LANES), jnp.float32),   # running max
            pltpu.VMEM((g, bt, _LANES), jnp.float32),   # running denom
            pltpu.VMEM((g, bt, d), jnp.float32),        # accumulator
        ],
        compiler_params=_compiler_params(("parallel", "parallel", "arbitrary"),
                                         need),
    )(q, k, v)


# ----------------------------------------------------------------------------
# Attention kernel with weights output (only when need_weights=True)
# ----------------------------------------------------------------------------
def _attn_weights_kernel(q_ref, k_ref, v_ref, o_ref, w_ref, *, mm_dtype):
    q = q_ref[...]                                    # (g, bt, d)  already scaled
    k = k_ref[...]                                    # (g, S, d)
    v = v_ref[...]
    if mm_dtype is not None:
        q = q.astype(mm_dtype)
        k = k.astype(mm_dtype)
        v = v.astype(mm_dtype)
    s = jnp.einsum("gqd,gkd->gqk", q, k,
                   preferred_element_type=jnp.float32)             # (g, bt, S)
    s = s - jnp.max(s, axis=-1, keepdims=True)
    p = jnp.exp(s)
    p = p / jnp.sum(p, axis=-1, keepdims=True)   # exact: weights are returned
    w_ref[...] = p.astype(w_ref.dtype)
    o_ref[...] = jnp.einsum("gqk,gkd->gqd", p.astype(v.dtype), v,
                            preferred_element_type=jnp.float32
                            ).astype(o_ref.dtype)


def pallas_attention_with_weights(q, k, v, *, block_g=2, block_t=256,
                                  mm_dtype=None):
    """q: [BH, T, D], k/v: [BH, S, D] -> (out [BH, T, D], w [BH, T, S])."""
    bh, t, d = q.shape
    s_len = k.shape[1]
    mult = _sublane_mult(q.dtype)
    g = _largest_divisor(bh, min(block_g, max(bh // 2, 1)))
    bt = _pick_seq_tile(t, block_t, mult)
    itm = jnp.dtype(q.dtype).itemsize
    need = (2 * (2 * g * bt * d + 2 * g * s_len * d + g * bt * s_len) * itm
            + 2 * g * bt * s_len * 4)
    return pl.pallas_call(
        functools.partial(_attn_weights_kernel, mm_dtype=mm_dtype),
        out_shape=(
            jax.ShapeDtypeStruct((bh, t, d), q.dtype),
            jax.ShapeDtypeStruct((bh, t, s_len), q.dtype),
        ),
        grid=(bh // g, t // bt),
        in_specs=[
            pl.BlockSpec((g, bt, d), lambda i, j: (i, j, 0)),
            pl.BlockSpec((g, s_len, d), lambda i, j: (i, 0, 0)),
            pl.BlockSpec((g, s_len, d), lambda i, j: (i, 0, 0)),
        ],
        out_specs=(
            pl.BlockSpec((g, bt, d), lambda i, j: (i, j, 0)),
            pl.BlockSpec((g, bt, s_len), lambda i, j: (i, j, 0)),
        ),
        compiler_params=_compiler_params(("parallel", "parallel"), need),
    )(q, k, v)


# ----------------------------------------------------------------------------
# Module wrapper (glue in plain JAX)
# ----------------------------------------------------------------------------
def init_params(key, embed_dim):
    e = embed_dim
    out_total = 3 * e     # embed_dim + k_dim + v_dim (all equal here)
    k1, k2, k3, k4 = jax.random.split(key, 4)
    lim_in = (6.0 / (e + out_total)) ** 0.5
    in_proj_w = jax.random.uniform(k1, (out_total, e), jnp.float32,
                                   -lim_in, lim_in)
    lim_out = (6.0 / (e + e)) ** 0.5
    out_proj_w = jax.random.uniform(k2, (e, e), jnp.float32, -lim_out, lim_out)
    # Module inits biases to 0; use small random values here so the bias path
    # is exercised numerically (reference uses the same params).
    in_proj_b = 0.02 * jax.random.normal(k3, (out_total,), jnp.float32)
    out_proj_b = 0.02 * jax.random.normal(k4, (e,), jnp.float32)
    return dict(in_proj_w=in_proj_w, in_proj_b=in_proj_b,
                out_proj_w=out_proj_w, out_proj_b=out_proj_b)


def _in_projection(query, key, value, params, e, scaling, mm_dtype):
    """Mirrors MultiHeadAttention.in_projection.  The softmax scaling is folded
    into the query projection weights/bias (free).  Returns (array, col-offset)
    pairs so the fused attention path can read heads straight out of the
    projection output without any XLA slicing."""
    w, bias = params["in_proj_w"], params["in_proj_b"]
    if query is key and key is value:
        w_f = jnp.concatenate([w[:e] * scaling, w[e:]], axis=0)
        b_f = jnp.concatenate([bias[:e] * scaling, bias[e:]], axis=0)
        qkv = pallas_linear(query.reshape(-1, e), w_f, b_f, mm_dtype=mm_dtype)
        return (qkv, 0), (qkv, e), (qkv, 2 * e)
    if key is value:
        q = pallas_linear(query.reshape(-1, e), w[:e] * scaling,
                          bias[:e] * scaling, mm_dtype=mm_dtype)
        kv = pallas_linear(key.reshape(-1, e), w[e:], bias[e:],
                           mm_dtype=mm_dtype)
        return (q, 0), (kv, 0), (kv, e)
    q = pallas_linear(query.reshape(-1, e), w[:e] * scaling, bias[:e] * scaling,
                      mm_dtype=mm_dtype)
    k = pallas_linear(key.reshape(-1, e), w[e:2 * e], bias[e:2 * e],
                      mm_dtype=mm_dtype)
    v = pallas_linear(value.reshape(-1, e), w[2 * e:], bias[2 * e:],
                      mm_dtype=mm_dtype)
    return (q, 0), (k, 0), (v, 0)


def mha_forward(query, key, value, params, num_heads, scale_factor=1.0,
                need_weights=False, mm_dtype=None):
    """query: [B, T, E], key/value: [B, S, E]  (batch_first=True)."""
    b, t, e = query.shape
    s_len = key.shape[1]
    assert key.shape[:2] == value.shape[:2]
    h = num_heads
    d = e // h
    scaling = float(d * scale_factor) ** (-0.5)

    (q_src, q_col), (k_src, k_col), (v_src, v_col) = _in_projection(
        query, key, value, params, e, scaling, mm_dtype)

    use_fused = ((not need_weights) and d % _LANES == 0
                 and t % 8 == 0 and s_len % 8 == 0)

    if use_fused:
        # No XLA head split/merge: heads read/written via BlockSpec offsets.
        attn2d = pallas_flash_attention_fused(
            q_src, k_src, v_src, B=b, H=h, T=t, S=s_len, D=d,
            q_col=q_col, k_col=k_col, v_col=v_col,
            out_dtype=query.dtype, mm_dtype=mm_dtype)
        weights = jnp.empty((0,), jnp.float32)
    else:
        q2 = lax.slice_in_dim(q_src, q_col, q_col + e, axis=1)
        k2 = lax.slice_in_dim(k_src, k_col, k_col + e, axis=1)
        v2 = lax.slice_in_dim(v_src, v_col, v_col + e, axis=1)
        # split heads: [B*T, E] -> [B*H, T, D]  (b-major, h-minor, as in torch)
        q3 = q2.reshape(b, t, h, d).transpose(0, 2, 1, 3).reshape(b * h, t, d)
        k3 = k2.reshape(b, s_len, h, d).transpose(0, 2, 1, 3).reshape(b * h, s_len, d)
        v3 = v2.reshape(b, s_len, h, d).transpose(0, 2, 1, 3).reshape(b * h, s_len, d)
        if need_weights:
            o3, w3 = pallas_attention_with_weights(q3, k3, v3, mm_dtype=mm_dtype)
            weights = w3.reshape(b, h, t, s_len).astype(jnp.float32)
        else:
            o3 = pallas_flash_attention(q3, k3, v3, mm_dtype=mm_dtype)
            weights = jnp.empty((0,), jnp.float32)
        attn2d = o3.reshape(b, h, t, d).transpose(0, 2, 1, 3).reshape(b * t, e)

    out = pallas_linear(attn2d, params["out_proj_w"], params["out_proj_b"],
                        mm_dtype=mm_dtype).reshape(b, t, e)
    return out, weights


# ----------------------------------------------------------------------------
# Pure-JAX reference for a sanity check
# ----------------------------------------------------------------------------
def mha_reference(query, key, value, params, num_heads, scale_factor=1.0):
    b, t, e = query.shape
    s = key.shape[1]
    h = num_heads
    d = e // h
    scaling = float(d * scale_factor) ** (-0.5)
    w, bias = params["in_proj_w"], params["in_proj_b"]
    q = query @ w[:e].T + bias[:e]
    k = key @ w[e:2 * e].T + bias[e:2 * e]
    v = value @ w[2 * e:].T + bias[2 * e:]
    q = q.reshape(b, t, h, d).transpose(0, 2, 1, 3) * scaling
    k = k.reshape(b, s, h, d).transpose(0, 2, 1, 3)
    v = v.reshape(b, s, h, d).transpose(0, 2, 1, 3)
    a = jnp.einsum("bhtd,bhsd->bhts", q, k)
    a = jax.nn.softmax(a, axis=-1)
    o = jnp.einsum("bhts,bhsd->bhtd", a, v)
    o = o.transpose(0, 2, 1, 3).reshape(b, t, e)
    o = o @ params["out_proj_w"].T + params["out_proj_b"]
    return o, a


if __name__ == "__main__":
    root = jax.random.PRNGKey(0)
    kq, kk, kv, kp, kx, kp2 = jax.random.split(root, 6)

    # ---- small-shape test (fallback [B*H, T, D] path, head_dim = 8) --------
    B, T, S, E, H = 2, 8, 8, 32, 4
    query = jax.random.normal(kq, (B, T, E), jnp.float32)
    key_in = jax.random.normal(kk, (B, S, E), jnp.float32)
    value = jax.random.normal(kv, (B, S, E), jnp.float32)
    params = init_params(kp, E)

    ref_out, ref_w = mha_reference(query, key_in, value, params, num_heads=H)

    # 1) default path: need_weights=False (flash attention, no weights output)
    out, w_empty = mha_forward(query, key_in, value, params, num_heads=H)
    out = jax.block_until_ready(out)
    assert out.shape == (B, T, E) and w_empty.shape == (0,)
    assert jnp.allclose(out, ref_out, atol=2e-2, rtol=2e-2)

    # 2) need_weights=True path (returns the full attention weights)
    out_w, weights = mha_forward(query, key_in, value, params, num_heads=H,
                                 need_weights=True)
    jax.block_until_ready((out_w, weights))
    assert out_w.shape == (B, T, E) and weights.shape == (B, H, T, S)
    assert jnp.allclose(out_w, ref_out, atol=2e-2, rtol=2e-2)
    assert jnp.allclose(weights, ref_w, atol=2e-2, rtol=2e-2)

    # 3) self-attention: fused single [3E, E] in-projection path
    self_out, _ = mha_forward(query, query, query, params, num_heads=H)
    self_ref, _ = mha_reference(query, query, query, params, num_heads=H)
    assert jnp.allclose(jax.block_until_ready(self_out), self_ref,
                        atol=2e-2, rtol=2e-2)

    # ---- fused-layout test (head_dim = 128: no XLA head split/merge) -------
    B2, T2, E2, H2 = 2, 16, 256, 2
    x2 = jax.random.normal(kx, (B2, T2, E2), jnp.float32)
    params2 = init_params(kp2, E2)
    fused_out, _ = mha_forward(x2, x2, x2, params2, num_heads=H2)
    fused_ref, _ = mha_reference(x2, x2, x2, params2, num_heads=H2)
    assert fused_out.shape == (B2, T2, E2)
    assert jnp.allclose(jax.block_until_ready(fused_out), fused_ref,
                        atol=2e-2, rtol=2e-2)

    # ---- optional bf16-MXU path (v6e/v7x fast matmuls), looser tolerance ---
    bf_out, _ = mha_forward(x2, x2, x2, params2, num_heads=H2,
                            mm_dtype=jnp.bfloat16)
    assert jnp.allclose(jax.block_until_ready(bf_out), fused_ref,
                        atol=5e-2, rtol=5e-2)

    print("KERNEL_OK")
</pallas_src>

<mosaic_0001>
module attributes {stable_mosaic.version = 11 : i64} {
  func.func @_linear_kernel(%arg0: i32, %arg1: i32, %arg2: i32, %arg3: memref<16x32xf32, #tpu.memory_space<vmem>>, %arg4: memref<32x32xf32, #tpu.memory_space<vmem>>, %arg5: memref<1x32xf32, #tpu.memory_space<vmem>>, %arg6: memref<16x32xf32, #tpu.memory_space<vmem>>, %arg7: memref<16x32xf32, #tpu.memory_space<vmem>>) attributes {dimension_semantics = [#tpu.dimension_semantics<parallel>, #tpu.dimension_semantics<parallel>, #tpu.dimension_semantics<arbitrary>], iteration_bounds = array<i64: 1, 1, 1>, scalar_prefetch = 0 : i64, scratch_operands = 1 : i64, tpu.core_type = #tpu.core_type<tc>, window_params = [{transform_indices = @transform_0, window_bounds = array<i64: 16, 32>}, {transform_indices = @transform_1, window_bounds = array<i64: 32, 32>}, {transform_indices = @transform_2, window_bounds = array<i64: 1, 32>}, {transform_indices = @transform_3, window_bounds = array<i64: 16, 32>}]} {
    %c0_i32 = arith.constant 0 : i32
    %0 = arith.cmpi eq, %arg2, %c0_i32 : i32
    %1 = arith.extui %0 : i1 to i32
    %c0_i32_0 = arith.constant 0 : i32
    %2 = arith.cmpi ne, %1, %c0_i32_0 : i32
    scf.if %2 {
      %cst_10 = arith.constant 0.000000e+00 : f32
      %12 = vector.broadcast %cst_10 : f32 to vector<16x32xf32>
      %c0_11 = arith.constant 0 : index
      %c0_12 = arith.constant 0 : index
      %13 = vector.load %arg7[%c0_11, %c0_12] : memref<16x32xf32, #tpu.memory_space<vmem>>, vector<16x32xf32>
      tpu.vector_store %arg7[%c0_11, %c0_12], %12 {strides = array<i32>} : memref<16x32xf32, #tpu.memory_space<vmem>>, vector<16x32xf32>,
    } else {
    }
    %c0 = arith.constant 0 : index
    %c0_1 = arith.constant 0 : index
    %3 = vector.load %arg3[%c0, %c0_1] : memref<16x32xf32, #tpu.memory_space<vmem>>, vector<16x32xf32>
    %c0_2 = arith.constant 0 : index
    %c0_3 = arith.constant 0 : index
    %4 = vector.load %arg4[%c0_2, %c0_3] : memref<32x32xf32, #tpu.memory_space<vmem>>, vector<32x32xf32>
    %c0_4 = arith.constant 0 : index
    %c0_5 = arith.constant 0 : index
    %5 = vector.load %arg7[%c0_4, %c0_5] : memref<16x32xf32, #tpu.memory_space<vmem>>, vector<16x32xf32>
    %cst = arith.constant dense<0.000000e+00> : vector<16x32xf32>
    %6 = tpu.matmul %3, %4, %cst {dimension_numbers = #tpu.dot_dimension_numbers<[1], [1], [0], [0], [0, 0, 1, 0], [], []>} : vector<16x32xf32>, vector<32x32xf32>, vector<16x32xf32> -> vector<16x32xf32>
    %7 = arith.addf %5, %6 : vector<16x32xf32>
    %c0_6 = arith.constant 0 : index
    %c0_7 = arith.constant 0 : index
    %8 = vector.load %arg7[%c0_6, %c0_7] : memref<16x32xf32, #tpu.memory_space<vmem>>, vector<16x32xf32>
    tpu.vector_store %arg7[%c0_6, %c0_7], %7 {strides = array<i32>} : memref<16x32xf32, #tpu.memory_space<vmem>>, vector<16x32xf32>,
    %c0_i32_8 = arith.constant 0 : i32
    %9 = arith.cmpi eq, %arg2, %c0_i32_8 : i32
    %10 = arith.extui %9 : i1 to i32
    %c0_i32_9 = arith.constant 0 : i32
    %11 = arith.cmpi ne, %10, %c0_i32_9 : i32
    scf.if %11 {
      %c0_10 = arith.constant 0 : index
      %c0_11 = arith.constant 0 : index
      %12 = vector.load %arg7[%c0_10, %c0_11] : memref<16x32xf32, #tpu.memory_space<vmem>>, vector<16x32xf32>
      %c0_12 = arith.constant 0 : index
      %c0_13 = arith.constant 0 : index
      %13 = vector.load %arg5[%c0_12, %c0_13] : memref<1x32xf32, #tpu.memory_space<vmem>>, vector<1x32xf32>
      %14 = vector.broadcast %13 : vector<1x32xf32> to vector<16x32xf32>
      %15 = arith.addf %12, %14 : vector<16x32xf32>
      %c0_14 = arith.constant 0 : index
      %c0_15 = arith.constant 0 : index
      %16 = vector.load %arg6[%c0_14, %c0_15] : memref<16x32xf32, #tpu.memory_space<vmem>>, vector<16x32xf32>
      tpu.vector_store %arg6[%c0_14, %c0_15], %15 {strides = array<i32>} : memref<16x32xf32, #tpu.memory_space<vmem>>, vector<16x32xf32>,
    } else {
    }
    return
  }
  func.func @transform_0(%arg0: i32, %arg1: i32, %arg2: i32) -> (i32, i32) {
    %c0_i32 = arith.constant 0 : i32
    return %arg0, %arg2 : i32, i32
  }
  func.func @transform_1(%arg0: i32, %arg1: i32, %arg2: i32) -> (i32, i32) {
    %c0_i32 = arith.constant 0 : i32
    return %arg1, %arg2 : i32, i32
  }
  func.func @transform_2(%arg0: i32, %arg1: i32, %arg2: i32) -> (i32, i32) {
    %c0_i32 = arith.constant 0 : i32
    %c0_i32_0 = arith.constant 0 : i32
    return %c0_i32, %arg1 : i32, i32
  }
  func.func @transform_3(%arg0: i32, %arg1: i32, %arg2: i32) -> (i32, i32) {
    %c0_i32 = arith.constant 0 : i32
    return %arg0, %arg1 : i32, i32
  }
}

</mosaic_0001>

<bundles_post_ra>
// kernel: tpu_custom_call.1
= control target key start
LH: loop header
LB: loop body
LE: loop exit
PB: predicated region body
PF: predicated region fallthrough
CT: control target
= control target key end

     0   :  { %8 = vsyncpa [#allocation4], 0  ;;  %s349_s0 = inlined_call_operand.hbm [shape: f32[16,32], index: 0, kind: input, shape index: {}]   ;;  %s350_s1 = inlined_call_operand.hbm [shape: f32[32,32], index: 1, kind: input, shape index: {}]   ;;  %s351_s2 = inlined_call_operand.vmem [shape: f32[1,32], index: 2, kind: input, shape index: {}]   ;;  %s352_s3 = inlined_call_operand.hbm [shape: f32[16,32], index: 3, kind: output, shape index: {}]  }
   0x1   :  { %9 = vsyncpa [#allocation7], 0 }
   0x2   :  { %10 = vsyncpa [#allocation5], 0  ;;  %s286_s12 = smov [#allocation3]  }
   0x3   :  { %s16_s13 = sshll.u32 %s286_s12, 4  ;;  %s17_s13 = int_to_ptr.vmem [resolvable:$true] %s16_s13 }
   0x4   :  { %s228_s14 = scalar_lea.vmem %s17_s13, 256  ;;  %p233_p1 = scmp.lt.s32.totalorder %s17_s13, %s17_s13 }
   0x5   :  { %p229_p0 = scmp.ne.s32.totalorder %s17_s13, %s228_s14  ;;  %p234_p2 = scmp.lt.s32.totalorder %s228_s14, %s228_s14 }
   0x7   :  { %p235_p3 = por %p234_p2, %p233_p1 }
   0x9   :  { %p236_p4 = pnand %p235_p3, %p229_p0 }
   0xb   :  { %239 = shalt.err (!%p236_p4)
}
   0xc   :  { %s287_s15 = smov 128   ;;  %s288_s16 = smov 8  }
   0xd   :  { %22 = dma.hbm_to_vmem [thread:$0]  %s349_s0, 256, %s17_s13, [#allocation4], %s287_s15, %s287_s15, %s288_s16  }
   0xe   :  { %s289_s19 = smov [#allocation6]  }
   0xf   :  { %s28_s20 = sshll.u32 %s289_s19, 4  ;;  %s29_s20 = int_to_ptr.vmem [resolvable:$true] %s28_s20 }
  0x10   :  { %s248_s21 = scalar_lea.vmem %s29_s20, 512  ;;  %p253_p6 = scmp.lt.s32.totalorder %s29_s20, %s29_s20 }
  0x11   :  { %p249_p5 = scmp.ne.s32.totalorder %s29_s20, %s248_s21  ;;  %p254_p7 = scmp.lt.s32.totalorder %s248_s21, %s248_s21 }
  0x13   :  { %p255_p8 = por %p254_p7, %p253_p6 }
  0x15   :  { %p256_p9 = pnand %p255_p8, %p249_p5 }
  0x17   :  { %259 = shalt.err (!%p256_p9)
}
  0x18   :  { %34 = dma.hbm_to_vmem [thread:$0]  %s350_s1, 512, %s29_s20, [#allocation7], %s287_s15, %s287_s15, %s288_s16  }
  0x19   :  { %280 = dma.done.wait [#allocation4], 256  }
  0x1a   :  { %281 = vsyncadd [#allocation4], 4294967040 }
  0x1b   :  { %282 = dma.done.wait [#allocation7], 512  }
  0x1c   :  { %283 = vsyncadd [#allocation7], 4294966784  ;;  %vm47_vm0 = vcmask 261120   ;;  %v290_v0 = vmov 0.0   ;;  %v55_v1 = vld [vmem:[#allocation6 + $0x18] sm:$0xff]  ;;  %v54_v2 = vld [vmem:[#allocation6 + $0x10] sm:$0xff] }
  0x1d   :  { %49 = vst.msk [vmem:[#allocation2 + $0x8] sm:$0xff] %vm47_vm0, %v290_v0  ;;  %48 = vst.msk [vmem:[#allocation2] sm:$0xff] %vm47_vm0, %v290_v0  ;;  %203 = vmatprep.subr.msk.mxu0 %vm47_vm0, %v55_v1  ;;  %v50_v3 = vld [vmem:[#allocation3] sm:$0xff]  ;;  %v53_v4 = vld [vmem:[#allocation6 + $0x8] sm:$0xff]  ;;  %s291_s24 = smov [#allocation8]  }
  0x1e   :  { %204 = vmatpush3.xpose.msk.msra.mxu0 %vm47_vm0, %v55_v1  ;;  %211 = vmatprep.mubr.msk.f32.mxu0 %vm47_vm0, %v50_v3  ;;  %v52_v5 = vld [vmem:[#allocation6] sm:$0xff]  ;;  %v51_v6 = vld [vmem:[#allocation3 + $0x8] sm:$0xff]  ;;  %s177_s25 = sshll.u32 %s291_s24, 4  ;;  %s178_s25 = int_to_ptr.vmem [resolvable:$true] %s177_s25 }
  0x1f   :  { %205 = vmatprep.subr.msk.mxu0 %vm47_vm0, %v54_v2  ;;  %v196_v13 = vld [vmem:[%s351_s2] ss:$0 sm:$0xff]  ;;  %s260_s26 = scalar_lea.vmem %s178_s25, 256  ;;  %p265_p11 = scmp.lt.s32.totalorder %s178_s25, %s178_s25 }
  0x20   :  { %p261_p10 = scmp.ne.s32.totalorder %s178_s25, %s260_s26  ;;  %p266_p12 = scmp.lt.s32.totalorder %s260_s26, %s260_s26 }
  0x22   :  { %206 = vmatpush3.xpose.msk.msra.mxu0 %vm47_vm0, %v54_v2  ;;  %p267_p13 = por %p266_p12, %p265_p11 }
  0x23   :  { %207 = vmatprep.subr.msk.mxu0 %vm47_vm0, %v53_v4 }
  0x24   :  { %v57_v7 = vld [vmem:[#allocation2 + $0x8] sm:$0xff]  ;;  %v56_v9 = vld [vmem:[#allocation2] sm:$0xff]  ;;  %p268_p0 = pnand %p267_p13, %p261_p10 }
  0x26   :  { %208 = vmatpush3.xpose.msk.msra.mxu0 %vm47_vm0, %v53_v4 }
  0x27   :  { %209 = vmatprep.subr.msk.mxu0 %vm47_vm0, %v52_v5 }
  0x2a   :  { %210 = vmatpush3.xpose.msk.msra.mxu0 %vm47_vm0, %v52_v5 }
  0x2d   :  { %212 = vmatmul.mubr.msk.f32.vlgmr.msra.gmra.mxu0 %vm47_vm0, %v51_v6 }
  0xed   :  { %v213_v8 = vpop.f32.mrf.mxu0 }
  0xee   :  { %v153_v10 = vadd.f32 %v213_v8, %v57_v7 }
  0xef   :  { %v143_v11 = vpop.f32.mrf.mxu0 }
  0xf0   :  { %155 = vst.msk [vmem:[#allocation2 + $0x8] sm:$0xff] %vm47_vm0, %v153_v10  ;;  %v152_v12 = vadd.f32 %v143_v11, %v56_v9 }
  0xf2   :  { %154 = vst.msk [vmem:[#allocation2] sm:$0xff] %vm47_vm0, %v152_v12 }
  0xf7   :  { %v160_v14 = vld [vmem:[#allocation2 + $0x8] sm:$0xff] }
  0xf8   :  { %v169_v15 = vadd.f32 %v196_v13, %v160_v14 }
  0xf9   :  { %v159_v16 = vld [vmem:[#allocation2] sm:$0xff] }
  0xfa   :  { %v168_v17 = vadd.f32 %v196_v13, %v159_v16  ;;  %171 = vst.msk [vmem:[#allocation8 + $0x8] sm:$0xff] %vm47_vm0, %v169_v15 }
  0xfc   :  { %170 = vst.msk [vmem:[#allocation8] sm:$0xff] %vm47_vm0, %v168_v17 }
  0xfd   :  { %271 = shalt.err (!%p268_p0)
}
  0xfe   :  { %183 = dma.vmem_to_hbm [thread:$0]  %s178_s25, 256, %s352_s3, [#allocation5], %s287_s15, %s287_s15, %s288_s16  }
  0xff   :  { %284 = dma.done.wait [#allocation5], 256  }
 0x100   :  { %285 = vsyncadd [#allocation5], 4294967040 }
 0x101   :  { %187 = vsyncpa [#allocation4], 1 }
 0x102   :  { %188 = vsyncpa [#allocation7], 1 }
 0x103   :  { %189 = vsyncpa [#allocation5], 1 }

</bundles_post_ra>
